<compile_context>
chip_gen: v5e
topology: v5e:2x2
jax: 0.10.0
libtpu: 0.0.40
codegen_flags: <defaults>
</compile_context>

<pallas_src>
import math
import functools

import jax
import jax.numpy as jnp
import numpy as np
from jax import lax
from jax.experimental import pallas as pl
from jax.experimental.pallas import tpu as pltpu


def mha_flash_kernel(q_ref, k_ref, v_ref, wo_ref, bo_ref, o_ref,
                     m_scratch, l_scratch, acc_scratch,
                     *, nheads, head_dim, embed_dim):
    """One (batch, q-tile, kv-tile) grid step of multi-head self-attention.

    q_ref   : (1, TQ, E) bf16  head-major queries, pre-scaled by 1/sqrt(D)
    k_ref   : (1, TK, E) bf16  head-major keys
    v_ref   : (1, TK, E) bf16  head-major values
    wo_ref  : (E, E)     bf16  fc_out weight (transposed)
    bo_ref  : (1, E)     f32   fc_out bias
    o_ref   : (1, TQ, E)
    scratch : m/l (H, TQ, 1) f32 ; acc (H, TQ, D) f32 (lane-dense per head)
    """
    ki = pl.program_id(2)
    nkv = pl.num_programs(2)
    H, D, E = nheads, head_dim, embed_dim

    @pl.when(ki == 0)
    def _init():
        m_scratch[...] = jnp.full(m_scratch.shape, -jnp.inf, dtype=jnp.float32)
        l_scratch[...] = jnp.zeros(l_scratch.shape, dtype=jnp.float32)
        acc_scratch[...] = jnp.zeros(acc_scratch.shape, dtype=jnp.float32)

    for h in range(H):                       # static, unrolled
        lo = h * D
        hi = lo + D
        qh = q_ref[0, :, lo:hi]              # (TQ, D) bf16 (pre-scaled)
        kh = k_ref[0, :, lo:hi]              # (TK, D) bf16
        vh = v_ref[0, :, lo:hi]              # (TK, D) bf16

        # logits = qh @ kh^T : bf16 operands, f32 accumulate on the MXU.
        s = lax.dot_general(qh, kh, (((1,), (1,)), ((), ())),
                            preferred_element_type=jnp.float32)  # (TQ, TK) f32

        # Online (flash) softmax update — statistics kept in f32.
        m_prev = m_scratch[h]                                    # (TQ, 1)
        m_new = jnp.maximum(m_prev, jnp.max(s, axis=-1, keepdims=True))
        alpha = jnp.exp(m_prev - m_new)                          # (TQ, 1)
        p = jnp.exp(s - m_new)                                   # (TQ, TK) f32
        l_scratch[h] = alpha * l_scratch[h] + jnp.sum(p, axis=-1, keepdims=True)
        acc_scratch[h] = alpha * acc_scratch[h] + jnp.dot(
            p.astype(jnp.bfloat16), vh, preferred_element_type=jnp.float32)
        m_scratch[h] = m_new

    @pl.when(ki == nkv - 1)
    def _finalize():
        # Exact per-head normalization (once per q-tile) + fused fc_out done as
        # per-head (TQ,D)@(D,E) partial matmuls summed: the (H,TQ,D)->(TQ,E)
        # relayout is never materialized.
        tq = acc_scratch.shape[1]
        out = jnp.zeros((tq, E), dtype=jnp.float32)
        for h in range(H):
            oh = (acc_scratch[h] / l_scratch[h]).astype(jnp.bfloat16)  # (TQ, D)
            out = out + jnp.dot(oh, wo_ref[h * D:(h + 1) * D, :],
                                preferred_element_type=jnp.float32)
        o_ref[0] = (out + bo_ref[...]).astype(o_ref.dtype)


def _pick_tile(length, target):
    """Largest tile <= target that divides `length` and keeps the (8,128)
    block-shape rule (multiple of 8 on the sublane axis, or the full dim)."""
    if length <= target:
        return length
    for t in range(target, 0, -1):
        if length % t == 0 and t % 8 == 0:
            return t
    return length


def multi_head_attention(x, qkv_weight, fc_out_weight, fc_out_bias, nheads,
                         q_tile=128, kv_tile=256):
    """x: (B, S, E) f32; qkv_weight: (3D, D); fc_out_weight: (E, E); bias: (E,)."""
    B, S, E = x.shape
    assert E % nheads == 0
    D = E // nheads
    assert qkv_weight.shape == (3 * D, D)
    assert fc_out_weight.shape == (E, E)
    assert fc_out_bias.shape == (E,)

    TQ = _pick_tile(S, q_tile)
    TK = _pick_tile(S, kv_tile)

    # ---- Hoisted Q/K/V projection (once, outside the flash grid), with the
    # original shared (3D, D) per-head weight — no block-diagonal kron lift. ----
    xh = x.reshape(B, S, nheads, D)
    qkv = jnp.einsum('bshd,ed->bshe', xh, qkv_weight)            # (B,S,H,3D) f32
    q, k, v = jnp.split(qkv, 3, axis=-1)                         # (B,S,H,D) each
    inv_sqrt_d = 1.0 / math.sqrt(D)
    q = (q * inv_sqrt_d).reshape(B, S, E).astype(jnp.bfloat16)   # head-major, scaled
    k = k.reshape(B, S, E).astype(jnp.bfloat16)
    v = v.reshape(B, S, E).astype(jnp.bfloat16)

    woT = fc_out_weight.T.astype(jnp.bfloat16)                   # (E, E) bf16
    bo = fc_out_bias.reshape(1, E).astype(jnp.float32)

    kernel = functools.partial(mha_flash_kernel, nheads=nheads, head_dim=D,
                               embed_dim=E)
    # batch & q-tile axes parallel (megacore: keep B * S/TQ >= 2 on v7x),
    # kv axis innermost / arbitrary (online-softmax accumulation).
    grid = (B, S // TQ, S // TK)

    # Explicit VMEM budget (v7x has only 64 MiB physical VMEM).
    bf16, f32 = 2, 4
    vmem_bytes = (
        2 * (TQ * E + 2 * TK * E) * bf16                # double-buffered q/k/v tiles
        + 2 * TQ * E * f32                              # double-buffered output tile
        + E * E * bf16 + E * f32                        # single-buffered wo / bias
        + (2 * nheads * TQ + nheads * TQ * D + TQ * E) * f32)   # scratch + slack
    vmem_limit = min(max(int(vmem_bytes * 1.5), 4 * 1024 * 1024), 100 * 1024 * 1024)

    flops = 4 * B * S * S * E + 2 * B * S * E * E
    transcendentals = B * nheads * S * S
    bytes_accessed = (B * S * E * bf16                       # q (read once per q-tile)
                      + 2 * (S // TQ) * B * S * E * bf16     # k, v re-read per q-tile
                      + B * S * E * f32                      # output
                      + E * E * bf16 + E * f32)              # weights / bias

    return pl.pallas_call(
        kernel,
        out_shape=jax.ShapeDtypeStruct((B, S, E), x.dtype),
        grid_spec=pltpu.PrefetchScalarGridSpec(
            num_scalar_prefetch=0,
            grid=grid,
            in_specs=[
                pl.BlockSpec((1, TQ, E), lambda b, qi, ki: (b, qi, 0)),   # q tile
                pl.BlockSpec((1, TK, E), lambda b, qi, ki: (b, ki, 0)),   # k tile
                pl.BlockSpec((1, TK, E), lambda b, qi, ki: (b, ki, 0)),   # v tile
                pl.BlockSpec((E, E), lambda b, qi, ki: (0, 0),
                             pipeline_mode=pl.Buffered(1)),               # WoT (const)
                pl.BlockSpec((1, E), lambda b, qi, ki: (0, 0),
                             pipeline_mode=pl.Buffered(1)),               # bias (const)
            ],
            out_specs=pl.BlockSpec((1, TQ, E), lambda b, qi, ki: (b, qi, 0)),
            scratch_shapes=[
                pltpu.VMEM((nheads, TQ, 1), jnp.float32),   # running max
                pltpu.VMEM((nheads, TQ, 1), jnp.float32),   # running sum
                pltpu.VMEM((nheads, TQ, D), jnp.float32),   # per-head acc (lane-dense)
            ],
        ),
        compiler_params=pltpu.CompilerParams(
            dimension_semantics=("parallel", "parallel", "arbitrary"),
            vmem_limit_bytes=vmem_limit),
        cost_estimate=pl.CostEstimate(flops=flops,
                                      transcendentals=transcendentals,
                                      bytes_accessed=bytes_accessed),
    )(q, k, v, woT, bo)


def reference_mha(x, qkv_weight, fc_out_weight, fc_out_bias, nheads):
    """Pure-JAX reference mirroring the PyTorch forward (no masks, eval dropout)."""
    B, S, E = x.shape
    D = E // nheads
    xr = x.reshape(B, S, nheads, D)
    qkv = jnp.einsum('bshd,ed->bshe', xr, qkv_weight)            # (B,S,H,3D)
    q, k, v = jnp.split(qkv, 3, axis=-1)
    logits = jnp.einsum('bqhd,bkhd->bhqk', q, k)
    product = logits / math.sqrt(D)
    scores = jax.nn.softmax(product, axis=-1)
    out = jnp.einsum('bhql,blhd->bqhd', scores, v).reshape(B, S, E)
    return out @ fc_out_weight.T + fc_out_bias


def xavier_uniform(key, shape, fan_in, fan_out, dtype=jnp.float32):
    bound = math.sqrt(6.0 / (fan_in + fan_out))
    return jax.random.uniform(key, shape, dtype=dtype, minval=-bound, maxval=bound)


if __name__ == "__main__":
    # Small, module-consistent shapes: embed_dim=32, nheads=4 -> head_dim=8.
    B, S, E, H = 2, 8, 32, 4
    D = E // H

    key = jax.random.PRNGKey(0)
    kx, kqkv, kw, kb = jax.random.split(key, 4)

    x = jax.random.normal(kx, (B, S, E), dtype=jnp.float32)

    # qkv_proj.weight: (3D, D), xavier_uniform, no bias (qkv_bias=False default)
    qkv_weight = xavier_uniform(kqkv, (3 * D, D), fan_in=D, fan_out=3 * D)
    # fc_out.weight: (E, E) xavier_uniform; fc_out.bias: uniform(-1/sqrt(E), 1/sqrt(E))
    fc_out_weight = xavier_uniform(kw, (E, E), fan_in=E, fan_out=E)
    fc_bound = 1.0 / math.sqrt(E)
    fc_out_bias = jax.random.uniform(kb, (E,), dtype=jnp.float32,
                                     minval=-fc_bound, maxval=fc_bound)

    out = multi_head_attention(x, qkv_weight, fc_out_weight, fc_out_bias, nheads=H)
    out = jax.block_until_ready(out)

    ref = reference_mha(x, qkv_weight, fc_out_weight, fc_out_bias, nheads=H)
    # Tolerance reflects bf16 MXU operands (f32 accumulation) inside the kernel;
    # flash statistics, exp and the final normalization remain f32.
    np.testing.assert_allclose(np.asarray(out), np.asarray(ref),
                               rtol=2e-2, atol=2e-2)

    print("KERNEL_OK")
</pallas_src>

<mosaic_0001>
module attributes {stable_mosaic.version = 11 : i64} {
  func.func @mha_flash_kernel(%arg0: i32, %arg1: i32, %arg2: i32, %arg3: memref<1x8x32xbf16, #tpu.memory_space<vmem>>, %arg4: memref<1x8x32xbf16, #tpu.memory_space<vmem>>, %arg5: memref<1x8x32xbf16, #tpu.memory_space<vmem>>, %arg6: memref<32x32xbf16, #tpu.memory_space<vmem>>, %arg7: memref<1x32xf32, #tpu.memory_space<vmem>>, %arg8: memref<1x8x32xf32, #tpu.memory_space<vmem>>, %arg9: memref<4x8x1xf32, #tpu.memory_space<vmem>>, %arg10: memref<4x8x1xf32, #tpu.memory_space<vmem>>, %arg11: memref<4x8x8xf32, #tpu.memory_space<vmem>>) attributes {dimension_semantics = [#tpu.dimension_semantics<parallel>, #tpu.dimension_semantics<parallel>, #tpu.dimension_semantics<arbitrary>], iteration_bounds = array<i64: 2, 1, 1>, scalar_prefetch = 0 : i64, scratch_operands = 3 : i64, tpu.core_type = #tpu.core_type<tc>, window_params = [{transform_indices = @transform_0, window_bounds = array<i64: 1, 8, 32>}, {transform_indices = @transform_1, window_bounds = array<i64: 1, 8, 32>}, {transform_indices = @transform_2, window_bounds = array<i64: 1, 8, 32>}, {pipeline_mode = #tpu.pipeline_mode<synchronous>, transform_indices = @transform_3, window_bounds = array<i64: 32, 32>}, {pipeline_mode = #tpu.pipeline_mode<synchronous>, transform_indices = @transform_4, window_bounds = array<i64: 1, 32>}, {transform_indices = @transform_5, window_bounds = array<i64: 1, 8, 32>}]} {
    %c0_i32 = arith.constant 0 : i32
    %0 = arith.cmpi eq, %arg2, %c0_i32 : i32
    %1 = arith.extui %0 : i1 to i32
    %c0_i32_0 = arith.constant 0 : i32
    %2 = arith.cmpi ne, %1, %c0_i32_0 : i32
    scf.if %2 {
      %cst_119 = arith.constant 0xFF800000 : f32
      %162 = vector.broadcast %cst_119 : f32 to vector<4x8x1xf32>
      %c0_120 = arith.constant 0 : index
      %c0_121 = arith.constant 0 : index
      %c0_122 = arith.constant 0 : index
      %163 = vector.load %arg9[%c0_120, %c0_121, %c0_122] : memref<4x8x1xf32, #tpu.memory_space<vmem>>, vector<4x8x1xf32>
      tpu.vector_store %arg9[%c0_120, %c0_121, %c0_122], %162 {strides = array<i32>} : memref<4x8x1xf32, #tpu.memory_space<vmem>>, vector<4x8x1xf32>,
      %cst_123 = arith.constant 0.000000e+00 : f32
      %164 = vector.broadcast %cst_123 : f32 to vector<4x8x1xf32>
      %c0_124 = arith.constant 0 : index
      %c0_125 = arith.constant 0 : index
      %c0_126 = arith.constant 0 : index
      %165 = vector.load %arg10[%c0_124, %c0_125, %c0_126] : memref<4x8x1xf32, #tpu.memory_space<vmem>>, vector<4x8x1xf32>
      tpu.vector_store %arg10[%c0_124, %c0_125, %c0_126], %164 {strides = array<i32>} : memref<4x8x1xf32, #tpu.memory_space<vmem>>, vector<4x8x1xf32>,
      %cst_127 = arith.constant 0.000000e+00 : f32
      %166 = vector.broadcast %cst_127 : f32 to vector<4x8x8xf32>
      %c0_128 = arith.constant 0 : index
      %c0_129 = arith.constant 0 : index
      %c0_130 = arith.constant 0 : index
      %167 = vector.load %arg11[%c0_128, %c0_129, %c0_130] : memref<4x8x8xf32, #tpu.memory_space<vmem>>, vector<4x8x8xf32>
      tpu.vector_store %arg11[%c0_128, %c0_129, %c0_130], %166 {strides = array<i32>} : memref<4x8x8xf32, #tpu.memory_space<vmem>>, vector<4x8x8xf32>,
    } else {
    }
    %c0 = arith.constant 0 : index
    %c0_1 = arith.constant 0 : index
    %c0_2 = arith.constant 0 : index
    %3 = vector.load %arg3[%c0, %c0_1, %c0_2] : memref<1x8x32xbf16, #tpu.memory_space<vmem>>, vector<1x8x8xbf16>
    %4 = vector.shape_cast %3 : vector<1x8x8xbf16> to vector<8x8xbf16>
    %c0_3 = arith.constant 0 : index
    %c0_4 = arith.constant 0 : index
    %c0_5 = arith.constant 0 : index
    %5 = vector.load %arg4[%c0_3, %c0_4, %c0_5] : memref<1x8x32xbf16, #tpu.memory_space<vmem>>, vector<1x8x8xbf16>
    %6 = vector.shape_cast %5 : vector<1x8x8xbf16> to vector<8x8xbf16>
    %c0_6 = arith.constant 0 : index
    %c0_7 = arith.constant 0 : index
    %c0_8 = arith.constant 0 : index
    %7 = vector.load %arg5[%c0_6, %c0_7, %c0_8] : memref<1x8x32xbf16, #tpu.memory_space<vmem>>, vector<1x8x8xbf16>
    %8 = vector.shape_cast %7 : vector<1x8x8xbf16> to vector<8x8xbf16>
    %cst = arith.constant dense<0.000000e+00> : vector<8x8xf32>
    %9 = tpu.matmul %4, %6, %cst {dimension_numbers = #tpu.dot_dimension_numbers<[1], [1], [0], [0], [0, 0, 1, 0], [], []>} : vector<8x8xbf16>, vector<8x8xbf16>, vector<8x8xf32> -> vector<8x8xf32>
    %c0_9 = arith.constant 0 : index
    %c0_10 = arith.constant 0 : index
    %c0_11 = arith.constant 0 : index
    %10 = vector.load %arg9[%c0_9, %c0_10, %c0_11] : memref<4x8x1xf32, #tpu.memory_space<vmem>>, vector<1x8x1xf32>
    %11 = vector.shape_cast %10 : vector<1x8x1xf32> to vector<8x1xf32>
    %cst_12 = arith.constant dense<0xFF800000> : vector<8xf32>
    %12 = vector.multi_reduction <maximumf>, %9, %cst_12 [1] : vector<8x8xf32> to vector<8xf32>
    %13 = vector.shape_cast %12 : vector<8xf32> to vector<8x1xf32>
    %14 = arith.maximumf %11, %13 : vector<8x1xf32>
    %15 = arith.subf %11, %14 : vector<8x1xf32>
    %16 = math.exp %15 : vector<8x1xf32>
    %17 = vector.broadcast %14 : vector<8x1xf32> to vector<8x8xf32>
    %18 = arith.subf %9, %17 : vector<8x8xf32>
    %19 = math.exp %18 : vector<8x8xf32>
    %c0_13 = arith.constant 0 : index
    %c0_14 = arith.constant 0 : index
    %c0_15 = arith.constant 0 : index
    %20 = vector.load %arg10[%c0_13, %c0_14, %c0_15] : memref<4x8x1xf32, #tpu.memory_space<vmem>>, vector<1x8x1xf32>
    %21 = vector.shape_cast %20 : vector<1x8x1xf32> to vector<8x1xf32>
    %22 = arith.mulf %16, %21 : vector<8x1xf32>
    %cst_16 = arith.constant dense<0.000000e+00> : vector<8xf32>
    %23 = vector.multi_reduction <add>, %19, %cst_16 [1] : vector<8x8xf32> to vector<8xf32>
    %24 = vector.shape_cast %23 : vector<8xf32> to vector<8x1xf32>
    %25 = arith.addf %22, %24 : vector<8x1xf32>
    %c0_17 = arith.constant 0 : index
    %c0_18 = arith.constant 0 : index
    %c0_19 = arith.constant 0 : index
    %26 = vector.load %arg10[%c0_17, %c0_18, %c0_19] : memref<4x8x1xf32, #tpu.memory_space<vmem>>, vector<1x8x1xf32>
    %27 = vector.shape_cast %26 : vector<1x8x1xf32> to vector<8x1xf32>
    %28 = vector.shape_cast %25 : vector<8x1xf32> to vector<1x8x1xf32>
    tpu.vector_store %arg10[%c0_17, %c0_18, %c0_19], %28 {strides = array<i32>} : memref<4x8x1xf32, #tpu.memory_space<vmem>>, vector<1x8x1xf32>,
    %c0_20 = arith.constant 0 : index
    %c0_21 = arith.constant 0 : index
    %c0_22 = arith.constant 0 : index
    %29 = vector.load %arg11[%c0_20, %c0_21, %c0_22] : memref<4x8x8xf32, #tpu.memory_space<vmem>>, vector<1x8x8xf32>
    %30 = vector.shape_cast %29 : vector<1x8x8xf32> to vector<8x8xf32>
    %31 = vector.broadcast %16 : vector<8x1xf32> to vector<8x8xf32>
    %32 = arith.mulf %31, %30 : vector<8x8xf32>
    %33 = arith.truncf %19 : vector<8x8xf32> to vector<8x8xbf16>
    %cst_23 = arith.constant dense<0.000000e+00> : vector<8x8xf32>
    %34 = tpu.matmul %33, %8, %cst_23 {dimension_numbers = #tpu.dot_dimension_numbers<[1], [0], [0], [1], [0, 0, 1, 1], [], []>} : vector<8x8xbf16>, vector<8x8xbf16>, vector<8x8xf32> -> vector<8x8xf32>
    %35 = arith.addf %32, %34 : vector<8x8xf32>
    %c0_24 = arith.constant 0 : index
    %c0_25 = arith.constant 0 : index
    %c0_26 = arith.constant 0 : index
    %36 = vector.load %arg11[%c0_24, %c0_25, %c0_26] : memref<4x8x8xf32, #tpu.memory_space<vmem>>, vector<1x8x8xf32>
    %37 = vector.shape_cast %36 : vector<1x8x8xf32> to vector<8x8xf32>
    %38 = vector.shape_cast %35 : vector<8x8xf32> to vector<1x8x8xf32>
    tpu.vector_store %arg11[%c0_24, %c0_25, %c0_26], %38 {strides = array<i32>} : memref<4x8x8xf32, #tpu.memory_space<vmem>>, vector<1x8x8xf32>,
    %c0_27 = arith.constant 0 : index
    %c0_28 = arith.constant 0 : index
    %c0_29 = arith.constant 0 : index
    %39 = vector.load %arg9[%c0_27, %c0_28, %c0_29] : memref<4x8x1xf32, #tpu.memory_space<vmem>>, vector<1x8x1xf32>
    %40 = vector.shape_cast %39 : vector<1x8x1xf32> to vector<8x1xf32>
    %41 = vector.shape_cast %14 : vector<8x1xf32> to vector<1x8x1xf32>
    tpu.vector_store %arg9[%c0_27, %c0_28, %c0_29], %41 {strides = array<i32>} : memref<4x8x1xf32, #tpu.memory_space<vmem>>, vector<1x8x1xf32>,
    %c0_30 = arith.constant 0 : index
    %c0_31 = arith.constant 0 : index
    %c8 = arith.constant 8 : index
    %42 = vector.load %arg3[%c0_30, %c0_31, %c8] : memref<1x8x32xbf16, #tpu.memory_space<vmem>>, vector<1x8x8xbf16>
    %43 = vector.shape_cast %42 : vector<1x8x8xbf16> to vector<8x8xbf16>
    %c0_32 = arith.constant 0 : index
    %c0_33 = arith.constant 0 : index
    %c8_34 = arith.constant 8 : index
    %44 = vector.load %arg4[%c0_32, %c0_33, %c8_34] : memref<1x8x32xbf16, #tpu.memory_space<vmem>>, vector<1x8x8xbf16>
    %45 = vector.shape_cast %44 : vector<1x8x8xbf16> to vector<8x8xbf16>
    %c0_35 = arith.constant 0 : index
    %c0_36 = arith.constant 0 : index
    %c8_37 = arith.constant 8 : index
    %46 = vector.load %arg5[%c0_35, %c0_36, %c8_37] : memref<1x8x32xbf16, #tpu.memory_space<vmem>>, vector<1x8x8xbf16>
    %47 = vector.shape_cast %46 : vector<1x8x8xbf16> to vector<8x8xbf16>
    %cst_38 = arith.constant dense<0.000000e+00> : vector<8x8xf32>
    %48 = tpu.matmul %43, %45, %cst_38 {dimension_numbers = #tpu.dot_dimension_numbers<[1], [1], [0], [0], [0, 0, 1, 0], [], []>} : vector<8x8xbf16>, vector<8x8xbf16>, vector<8x8xf32> -> vector<8x8xf32>
    %c1 = arith.constant 1 : index
    %c0_39 = arith.constant 0 : index
    %c0_40 = arith.constant 0 : index
    %49 = vector.load %arg9[%c1, %c0_39, %c0_40] : memref<4x8x1xf32, #tpu.memory_space<vmem>>, vector<1x8x1xf32>
    %50 = vector.shape_cast %49 : vector<1x8x1xf32> to vector<8x1xf32>
    %cst_41 = arith.constant dense<0xFF800000> : vector<8xf32>
    %51 = vector.multi_reduction <maximumf>, %48, %cst_41 [1] : vector<8x8xf32> to vector<8xf32>
    %52 = vector.shape_cast %51 : vector<8xf32> to vector<8x1xf32>
    %53 = arith.maximumf %50, %52 : vector<8x1xf32>
    %54 = arith.subf %50, %53 : vector<8x1xf32>
    %55 = math.exp %54 : vector<8x1xf32>
    %56 = vector.broadcast %53 : vector<8x1xf32> to vector<8x8xf32>
    %57 = arith.subf %48, %56 : vector<8x8xf32>
    %58 = math.exp %57 : vector<8x8xf32>
    %c1_42 = arith.constant 1 : index
    %c0_43 = arith.constant 0 : index
    %c0_44 = arith.constant 0 : index
    %59 = vector.load %arg10[%c1_42, %c0_43, %c0_44] : memref<4x8x1xf32, #tpu.memory_space<vmem>>, vector<1x8x1xf32>
    %60 = vector.shape_cast %59 : vector<1x8x1xf32> to vector<8x1xf32>
    %61 = arith.mulf %55, %60 : vector<8x1xf32>
    %cst_45 = arith.constant dense<0.000000e+00> : vector<8xf32>
    %62 = vector.multi_reduction <add>, %58, %cst_45 [1] : vector<8x8xf32> to vector<8xf32>
    %63 = vector.shape_cast %62 : vector<8xf32> to vector<8x1xf32>
    %64 = arith.addf %61, %63 : vector<8x1xf32>
    %c1_46 = arith.constant 1 : index
    %c0_47 = arith.constant 0 : index
    %c0_48 = arith.constant 0 : index
    %65 = vector.load %arg10[%c1_46, %c0_47, %c0_48] : memref<4x8x1xf32, #tpu.memory_space<vmem>>, vector<1x8x1xf32>
    %66 = vector.shape_cast %65 : vector<1x8x1xf32> to vector<8x1xf32>
    %67 = vector.shape_cast %64 : vector<8x1xf32> to vector<1x8x1xf32>
    tpu.vector_store %arg10[%c1_46, %c0_47, %c0_48], %67 {strides = array<i32>} : memref<4x8x1xf32, #tpu.memory_space<vmem>>, vector<1x8x1xf32>,
    %c1_49 = arith.constant 1 : index
    %c0_50 = arith.constant 0 : index
    %c0_51 = arith.constant 0 : index
    %68 = vector.load %arg11[%c1_49, %c0_50, %c0_51] : memref<4x8x8xf32, #tpu.memory_space<vmem>>, vector<1x8x8xf32>
    %69 = vector.shape_cast %68 : vector<1x8x8xf32> to vector<8x8xf32>
    %70 = vector.broadcast %55 : vector<8x1xf32> to vector<8x8xf32>
    %71 = arith.mulf %70, %69 : vector<8x8xf32>
    %72 = arith.truncf %58 : vector<8x8xf32> to vector<8x8xbf16>
    %cst_52 = arith.constant dense<0.000000e+00> : vector<8x8xf32>
    %73 = tpu.matmul %72, %47, %cst_52 {dimension_numbers = #tpu.dot_dimension_numbers<[1], [0], [0], [1], [0, 0, 1, 1], [], []>} : vector<8x8xbf16>, vector<8x8xbf16>, vector<8x8xf32> -> vector<8x8xf32>
    %74 = arith.addf %71, %73 : vector<8x8xf32>
    %c1_53 = arith.constant 1 : index
    %c0_54 = arith.constant 0 : index
    %c0_55 = arith.constant 0 : index
    %75 = vector.load %arg11[%c1_53, %c0_54, %c0_55] : memref<4x8x8xf32, #tpu.memory_space<vmem>>, vector<1x8x8xf32>
    %76 = vector.shape_cast %75 : vector<1x8x8xf32> to vector<8x8xf32>
    %77 = vector.shape_cast %74 : vector<8x8xf32> to vector<1x8x8xf32>
    tpu.vector_store %arg11[%c1_53, %c0_54, %c0_55], %77 {strides = array<i32>} : memref<4x8x8xf32, #tpu.memory_space<vmem>>, vector<1x8x8xf32>,
    %c1_56 = arith.constant 1 : index
    %c0_57 = arith.constant 0 : index
    %c0_58 = arith.constant 0 : index
    %78 = vector.load %arg9[%c1_56, %c0_57, %c0_58] : memref<4x8x1xf32, #tpu.memory_space<vmem>>, vector<1x8x1xf32>
    %79 = vector.shape_cast %78 : vector<1x8x1xf32> to vector<8x1xf32>
    %80 = vector.shape_cast %53 : vector<8x1xf32> to vector<1x8x1xf32>
    tpu.vector_store %arg9[%c1_56, %c0_57, %c0_58], %80 {strides = array<i32>} : memref<4x8x1xf32, #tpu.memory_space<vmem>>, vector<1x8x1xf32>,
    %c0_59 = arith.constant 0 : index
    %c0_60 = arith.constant 0 : index
    %c16 = arith.constant 16 : index
    %81 = vector.load %arg3[%c0_59, %c0_60, %c16] : memref<1x8x32xbf16, #tpu.memory_space<vmem>>, vector<1x8x8xbf16>
    %82 = vector.shape_cast %81 : vector<1x8x8xbf16> to vector<8x8xbf16>
    %c0_61 = arith.constant 0 : index
    %c0_62 = arith.constant 0 : index
    %c16_63 = arith.constant 16 : index
    %83 = vector.load %arg4[%c0_61, %c0_62, %c16_63] : memref<1x8x32xbf16, #tpu.memory_space<vmem>>, vector<1x8x8xbf16>
    %84 = vector.shape_cast %83 : vector<1x8x8xbf16> to vector<8x8xbf16>
    %c0_64 = arith.constant 0 : index
    %c0_65 = arith.constant 0 : index
    %c16_66 = arith.constant 16 : index
    %85 = vector.load %arg5[%c0_64, %c0_65, %c16_66] : memref<1x8x32xbf16, #tpu.memory_space<vmem>>, vector<1x8x8xbf16>
    %86 = vector.shape_cast %85 : vector<1x8x8xbf16> to vector<8x8xbf16>
    %cst_67 = arith.constant dense<0.000000e+00> : vector<8x8xf32>
    %87 = tpu.matmul %82, %84, %cst_67 {dimension_numbers = #tpu.dot_dimension_numbers<[1], [1], [0], [0], [0, 0, 1, 0], [], []>} : vector<8x8xbf16>, vector<8x8xbf16>, vector<8x8xf32> -> vector<8x8xf32>
    %c2 = arith.constant 2 : index
    %c0_68 = arith.constant 0 : index
    %c0_69 = arith.constant 0 : index
    %88 = vector.load %arg9[%c2, %c0_68, %c0_69] : memref<4x8x1xf32, #tpu.memory_space<vmem>>, vector<1x8x1xf32>
    %89 = vector.shape_cast %88 : vector<1x8x1xf32> to vector<8x1xf32>
    %cst_70 = arith.constant dense<0xFF800000> : vector<8xf32>
    %90 = vector.multi_reduction <maximumf>, %87, %cst_70 [1] : vector<8x8xf32> to vector<8xf32>
    %91 = vector.shape_cast %90 : vector<8xf32> to vector<8x1xf32>
    %92 = arith.maximumf %89, %91 : vector<8x1xf32>
    %93 = arith.subf %89, %92 : vector<8x1xf32>
    %94 = math.exp %93 : vector<8x1xf32>
    %95 = vector.broadcast %92 : vector<8x1xf32> to vector<8x8xf32>
    %96 = arith.subf %87, %95 : vector<8x8xf32>
    %97 = math.exp %96 : vector<8x8xf32>
    %c2_71 = arith.constant 2 : index
    %c0_72 = arith.constant 0 : index
    %c0_73 = arith.constant 0 : index
    %98 = vector.load %arg10[%c2_71, %c0_72, %c0_73] : memref<4x8x1xf32, #tpu.memory_space<vmem>>, vector<1x8x1xf32>
    %99 = vector.shape_cast %98 : vector<1x8x1xf32> to vector<8x1xf32>
    %100 = arith.mulf %94, %99 : vector<8x1xf32>
    %cst_74 = arith.constant dense<0.000000e+00> : vector<8xf32>
    %101 = vector.multi_reduction <add>, %97, %cst_74 [1] : vector<8x8xf32> to vector<8xf32>
    %102 = vector.shape_cast %101 : vector<8xf32> to vector<8x1xf32>
    %103 = arith.addf %100, %102 : vector<8x1xf32>
    %c2_75 = arith.constant 2 : index
    %c0_76 = arith.constant 0 : index
    %c0_77 = arith.constant 0 : index
    %104 = vector.load %arg10[%c2_75, %c0_76, %c0_77] : memref<4x8x1xf32, #tpu.memory_space<vmem>>, vector<1x8x1xf32>
    %105 = vector.shape_cast %104 : vector<1x8x1xf32> to vector<8x1xf32>
    %106 = vector.shape_cast %103 : vector<8x1xf32> to vector<1x8x1xf32>
    tpu.vector_store %arg10[%c2_75, %c0_76, %c0_77], %106 {strides = array<i32>} : memref<4x8x1xf32, #tpu.memory_space<vmem>>, vector<1x8x1xf32>,
    %c2_78 = arith.constant 2 : index
    %c0_79 = arith.constant 0 : index
    %c0_80 = arith.constant 0 : index
    %107 = vector.load %arg11[%c2_78, %c0_79, %c0_80] : memref<4x8x8xf32, #tpu.memory_space<vmem>>, vector<1x8x8xf32>
    %108 = vector.shape_cast %107 : vector<1x8x8xf32> to vector<8x8xf32>
    %109 = vector.broadcast %94 : vector<8x1xf32> to vector<8x8xf32>
    %110 = arith.mulf %109, %108 : vector<8x8xf32>
    %111 = arith.truncf %97 : vector<8x8xf32> to vector<8x8xbf16>
    %cst_81 = arith.constant dense<0.000000e+00> : vector<8x8xf32>
    %112 = tpu.matmul %111, %86, %cst_81 {dimension_numbers = #tpu.dot_dimension_numbers<[1], [0], [0], [1], [0, 0, 1, 1], [], []>} : vector<8x8xbf16>, vector<8x8xbf16>, vector<8x8xf32> -> vector<8x8xf32>
    %113 = arith.addf %110, %112 : vector<8x8xf32>
    %c2_82 = arith.constant 2 : index
    %c0_83 = arith.constant 0 : index
    %c0_84 = arith.constant 0 : index
    %114 = vector.load %arg11[%c2_82, %c0_83, %c0_84] : memref<4x8x8xf32, #tpu.memory_space<vmem>>, vector<1x8x8xf32>
    %115 = vector.shape_cast %114 : vector<1x8x8xf32> to vector<8x8xf32>
    %116 = vector.shape_cast %113 : vector<8x8xf32> to vector<1x8x8xf32>
    tpu.vector_store %arg11[%c2_82, %c0_83, %c0_84], %116 {strides = array<i32>} : memref<4x8x8xf32, #tpu.memory_space<vmem>>, vector<1x8x8xf32>,
    %c2_85 = arith.constant 2 : index
    %c0_86 = arith.constant 0 : index
    %c0_87 = arith.constant 0 : index
    %117 = vector.load %arg9[%c2_85, %c0_86, %c0_87] : memref<4x8x1xf32, #tpu.memory_space<vmem>>, vector<1x8x1xf32>
    %118 = vector.shape_cast %117 : vector<1x8x1xf32> to vector<8x1xf32>
    %119 = vector.shape_cast %92 : vector<8x1xf32> to vector<1x8x1xf32>
    tpu.vector_store %arg9[%c2_85, %c0_86, %c0_87], %119 {strides = array<i32>} : memref<4x8x1xf32, #tpu.memory_space<vmem>>, vector<1x8x1xf32>,
    %c0_88 = arith.constant 0 : index
    %c0_89 = arith.constant 0 : index
    %c24 = arith.constant 24 : index
    %120 = vector.load %arg3[%c0_88, %c0_89, %c24] : memref<1x8x32xbf16, #tpu.memory_space<vmem>>, vector<1x8x8xbf16>
    %121 = vector.shape_cast %120 : vector<1x8x8xbf16> to vector<8x8xbf16>
    %c0_90 = arith.constant 0 : index
    %c0_91 = arith.constant 0 : index
    %c24_92 = arith.constant 24 : index
    %122 = vector.load %arg4[%c0_90, %c0_91, %c24_92] : memref<1x8x32xbf16, #tpu.memory_space<vmem>>, vector<1x8x8xbf16>
    %123 = vector.shape_cast %122 : vector<1x8x8xbf16> to vector<8x8xbf16>
    %c0_93 = arith.constant 0 : index
    %c0_94 = arith.constant 0 : index
    %c24_95 = arith.constant 24 : index
    %124 = vector.load %arg5[%c0_93, %c0_94, %c24_95] : memref<1x8x32xbf16, #tpu.memory_space<vmem>>, vector<1x8x8xbf16>
    %125 = vector.shape_cast %124 : vector<1x8x8xbf16> to vector<8x8xbf16>
    %cst_96 = arith.constant dense<0.000000e+00> : vector<8x8xf32>
    %126 = tpu.matmul %121, %123, %cst_96 {dimension_numbers = #tpu.dot_dimension_numbers<[1], [1], [0], [0], [0, 0, 1, 0], [], []>} : vector<8x8xbf16>, vector<8x8xbf16>, vector<8x8xf32> -> vector<8x8xf32>
    %c3 = arith.constant 3 : index
    %c0_97 = arith.constant 0 : index
    %c0_98 = arith.constant 0 : index
    %127 = vector.load %arg9[%c3, %c0_97, %c0_98] : memref<4x8x1xf32, #tpu.memory_space<vmem>>, vector<1x8x1xf32>
    %128 = vector.shape_cast %127 : vector<1x8x1xf32> to vector<8x1xf32>
    %cst_99 = arith.constant dense<0xFF800000> : vector<8xf32>
    %129 = vector.multi_reduction <maximumf>, %126, %cst_99 [1] : vector<8x8xf32> to vector<8xf32>
    %130 = vector.shape_cast %129 : vector<8xf32> to vector<8x1xf32>
    %131 = arith.maximumf %128, %130 : vector<8x1xf32>
    %132 = arith.subf %128, %131 : vector<8x1xf32>
    %133 = math.exp %132 : vector<8x1xf32>
    %134 = vector.broadcast %131 : vector<8x1xf32> to vector<8x8xf32>
    %135 = arith.subf %126, %134 : vector<8x8xf32>
    %136 = math.exp %135 : vector<8x8xf32>
    %c3_100 = arith.constant 3 : index
    %c0_101 = arith.constant 0 : index
    %c0_102 = arith.constant 0 : index
    %137 = vector.load %arg10[%c3_100, %c0_101, %c0_102] : memref<4x8x1xf32, #tpu.memory_space<vmem>>, vector<1x8x1xf32>
    %138 = vector.shape_cast %137 : vector<1x8x1xf32> to vector<8x1xf32>
    %139 = arith.mulf %133, %138 : vector<8x1xf32>
    %cst_103 = arith.constant dense<0.000000e+00> : vector<8xf32>
    %140 = vector.multi_reduction <add>, %136, %cst_103 [1] : vector<8x8xf32> to vector<8xf32>
    %141 = vector.shape_cast %140 : vector<8xf32> to vector<8x1xf32>
    %142 = arith.addf %139, %141 : vector<8x1xf32>
    %c3_104 = arith.constant 3 : index
    %c0_105 = arith.constant 0 : index
    %c0_106 = arith.constant 0 : index
    %143 = vector.load %arg10[%c3_104, %c0_105, %c0_106] : memref<4x8x1xf32, #tpu.memory_space<vmem>>, vector<1x8x1xf32>
    %144 = vector.shape_cast %143 : vector<1x8x1xf32> to vector<8x1xf32>
    %145 = vector.shape_cast %142 : vector<8x1xf32> to vector<1x8x1xf32>
    tpu.vector_store %arg10[%c3_104, %c0_105, %c0_106], %145 {strides = array<i32>} : memref<4x8x1xf32, #tpu.memory_space<vmem>>, vector<1x8x1xf32>,
    %c3_107 = arith.constant 3 : index
    %c0_108 = arith.constant 0 : index
    %c0_109 = arith.constant 0 : index
    %146 = vector.load %arg11[%c3_107, %c0_108, %c0_109] : memref<4x8x8xf32, #tpu.memory_space<vmem>>, vector<1x8x8xf32>
    %147 = vector.shape_cast %146 : vector<1x8x8xf32> to vector<8x8xf32>
    %148 = vector.broadcast %133 : vector<8x1xf32> to vector<8x8xf32>
    %149 = arith.mulf %148, %147 : vector<8x8xf32>
    %150 = arith.truncf %136 : vector<8x8xf32> to vector<8x8xbf16>
    %cst_110 = arith.constant dense<0.000000e+00> : vector<8x8xf32>
    %151 = tpu.matmul %150, %125, %cst_110 {dimension_numbers = #tpu.dot_dimension_numbers<[1], [0], [0], [1], [0, 0, 1, 1], [], []>} : vector<8x8xbf16>, vector<8x8xbf16>, vector<8x8xf32> -> vector<8x8xf32>
    %152 = arith.addf %149, %151 : vector<8x8xf32>
    %c3_111 = arith.constant 3 : index
    %c0_112 = arith.constant 0 : index
    %c0_113 = arith.constant 0 : index
    %153 = vector.load %arg11[%c3_111, %c0_112, %c0_113] : memref<4x8x8xf32, #tpu.memory_space<vmem>>, vector<1x8x8xf32>
    %154 = vector.shape_cast %153 : vector<1x8x8xf32> to vector<8x8xf32>
    %155 = vector.shape_cast %152 : vector<8x8xf32> to vector<1x8x8xf32>
    tpu.vector_store %arg11[%c3_111, %c0_112, %c0_113], %155 {strides = array<i32>} : memref<4x8x8xf32, #tpu.memory_space<vmem>>, vector<1x8x8xf32>,
    %c3_114 = arith.constant 3 : index
    %c0_115 = arith.constant 0 : index
    %c0_116 = arith.constant 0 : index
    %156 = vector.load %arg9[%c3_114, %c0_115, %c0_116] : memref<4x8x1xf32, #tpu.memory_space<vmem>>, vector<1x8x1xf32>
    %157 = vector.shape_cast %156 : vector<1x8x1xf32> to vector<8x1xf32>
    %158 = vector.shape_cast %131 : vector<8x1xf32> to vector<1x8x1xf32>
    tpu.vector_store %arg9[%c3_114, %c0_115, %c0_116], %158 {strides = array<i32>} : memref<4x8x1xf32, #tpu.memory_space<vmem>>, vector<1x8x1xf32>,
    %c0_i32_117 = arith.constant 0 : i32
    %159 = arith.cmpi eq, %arg2, %c0_i32_117 : i32
    %160 = arith.extui %159 : i1 to i32
    %c0_i32_118 = arith.constant 0 : i32
    %161 = arith.cmpi ne, %160, %c0_i32_118 : i32
    scf.if %161 {
      %cst_119 = arith.constant 0.000000e+00 : f32
      %162 = vector.broadcast %cst_119 : f32 to vector<8x32xf32>
      %c0_120 = arith.constant 0 : index
      %c0_121 = arith.constant 0 : index
      %c0_122 = arith.constant 0 : index
      %163 = vector.load %arg11[%c0_120, %c0_121, %c0_122] : memref<4x8x8xf32, #tpu.memory_space<vmem>>, vector<1x8x8xf32>
      %164 = vector.shape_cast %163 : vector<1x8x8xf32> to vector<8x8xf32>
      %c0_123 = arith.constant 0 : index
      %c0_124 = arith.constant 0 : index
      %c0_125 = arith.constant 0 : index
      %165 = vector.load %arg10[%c0_123, %c0_124, %c0_125] : memref<4x8x1xf32, #tpu.memory_space<vmem>>, vector<1x8x1xf32>
      %166 = vector.shape_cast %165 : vector<1x8x1xf32> to vector<8x1xf32>
      %167 = vector.broadcast %166 : vector<8x1xf32> to vector<8x8xf32>
      %168 = arith.divf %164, %167 : vector<8x8xf32>
      %169 = arith.truncf %168 : vector<8x8xf32> to vector<8x8xbf16>
      %c0_126 = arith.constant 0 : index
      %c0_127 = arith.constant 0 : index
      %170 = vector.load %arg6[%c0_126, %c0_127] : memref<32x32xbf16, #tpu.memory_space<vmem>>, vector<8x32xbf16>
      %cst_128 = arith.constant dense<0.000000e+00> : vector<8x32xf32>
      %171 = tpu.matmul %169, %170, %cst_128 {dimension_numbers = #tpu.dot_dimension_numbers<[1], [0], [0], [1], [0, 0, 1, 1], [], []>} : vector<8x8xbf16>, vector<8x32xbf16>, vector<8x32xf32> -> vector<8x32xf32>
      %172 = arith.addf %162, %171 : vector<8x32xf32>
      %c1_129 = arith.constant 1 : index
      %c0_130 = arith.constant 0 : index
      %c0_131 = arith.constant 0 : index
      %173 = vector.load %arg11[%c1_129, %c0_130, %c0_131] : memref<4x8x8xf32, #tpu.memory_space<vmem>>, vector<1x8x8xf32>
      %174 = vector.shape_cast %173 : vector<1x8x8xf32> to vector<8x8xf32>
      %c1_132 = arith.constant 1 : index
      %c0_133 = arith.constant 0 : index
      %c0_134 = arith.constant 0 : index
      %175 = vector.load %arg10[%c1_132, %c0_133, %c0_134] : memref<4x8x1xf32, #tpu.memory_space<vmem>>, vector<1x8x1xf32>
      %176 = vector.shape_cast %175 : vector<1x8x1xf32> to vector<8x1xf32>
      %177 = vector.broadcast %176 : vector<8x1xf32> to vector<8x8xf32>
      %178 = arith.divf %174, %177 : vector<8x8xf32>
      %179 = arith.truncf %178 : vector<8x8xf32> to vector<8x8xbf16>
      %c8_135 = arith.constant 8 : index
      %c0_136 = arith.constant 0 : index
      %180 = vector.load %arg6[%c8_135, %c0_136] : memref<32x32xbf16, #tpu.memory_space<vmem>>, vector<8x32xbf16>
      %cst_137 = arith.constant dense<0.000000e+00> : vector<8x32xf32>
      %181 = tpu.matmul %179, %180, %cst_137 {dimension_numbers = #tpu.dot_dimension_numbers<[1], [0], [0], [1], [0, 0, 1, 1], [], []>} : vector<8x8xbf16>, vector<8x32xbf16>, vector<8x32xf32> -> vector<8x32xf32>
      %182 = arith.addf %172, %181 : vector<8x32xf32>
      %c2_138 = arith.constant 2 : index
      %c0_139 = arith.constant 0 : index
      %c0_140 = arith.constant 0 : index
      %183 = vector.load %arg11[%c2_138, %c0_139, %c0_140] : memref<4x8x8xf32, #tpu.memory_space<vmem>>, vector<1x8x8xf32>
      %184 = vector.shape_cast %183 : vector<1x8x8xf32> to vector<8x8xf32>
      %c2_141 = arith.constant 2 : index
      %c0_142 = arith.constant 0 : index
      %c0_143 = arith.constant 0 : index
      %185 = vector.load %arg10[%c2_141, %c0_142, %c0_143] : memref<4x8x1xf32, #tpu.memory_space<vmem>>, vector<1x8x1xf32>
      %186 = vector.shape_cast %185 : vector<1x8x1xf32> to vector<8x1xf32>
      %187 = vector.broadcast %186 : vector<8x1xf32> to vector<8x8xf32>
      %188 = arith.divf %184, %187 : vector<8x8xf32>
      %189 = arith.truncf %188 : vector<8x8xf32> to vector<8x8xbf16>
      %c16_144 = arith.constant 16 : index
      %c0_145 = arith.constant 0 : index
      %190 = vector.load %arg6[%c16_144, %c0_145] : memref<32x32xbf16, #tpu.memory_space<vmem>>, vector<8x32xbf16>
      %cst_146 = arith.constant dense<0.000000e+00> : vector<8x32xf32>
      %191 = tpu.matmul %189, %190, %cst_146 {dimension_numbers = #tpu.dot_dimension_numbers<[1], [0], [0], [1], [0, 0, 1, 1], [], []>} : vector<8x8xbf16>, vector<8x32xbf16>, vector<8x32xf32> -> vector<8x32xf32>
      %192 = arith.addf %182, %191 : vector<8x32xf32>
      %c3_147 = arith.constant 3 : index
      %c0_148 = arith.constant 0 : index
      %c0_149 = arith.constant 0 : index
      %193 = vector.load %arg11[%c3_147, %c0_148, %c0_149] : memref<4x8x8xf32, #tpu.memory_space<vmem>>, vector<1x8x8xf32>
      %194 = vector.shape_cast %193 : vector<1x8x8xf32> to vector<8x8xf32>
      %c3_150 = arith.constant 3 : index
      %c0_151 = arith.constant 0 : index
      %c0_152 = arith.constant 0 : index
      %195 = vector.load %arg10[%c3_150, %c0_151, %c0_152] : memref<4x8x1xf32, #tpu.memory_space<vmem>>, vector<1x8x1xf32>
      %196 = vector.shape_cast %195 : vector<1x8x1xf32> to vector<8x1xf32>
      %197 = vector.broadcast %196 : vector<8x1xf32> to vector<8x8xf32>
      %198 = arith.divf %194, %197 : vector<8x8xf32>
      %199 = arith.truncf %198 : vector<8x8xf32> to vector<8x8xbf16>
      %c24_153 = arith.constant 24 : index
      %c0_154 = arith.constant 0 : index
      %200 = vector.load %arg6[%c24_153, %c0_154] : memref<32x32xbf16, #tpu.memory_space<vmem>>, vector<8x32xbf16>
      %cst_155 = arith.constant dense<0.000000e+00> : vector<8x32xf32>
      %201 = tpu.matmul %199, %200, %cst_155 {dimension_numbers = #tpu.dot_dimension_numbers<[1], [0], [0], [1], [0, 0, 1, 1], [], []>} : vector<8x8xbf16>, vector<8x32xbf16>, vector<8x32xf32> -> vector<8x32xf32>
      %202 = arith.addf %192, %201 : vector<8x32xf32>
      %c0_156 = arith.constant 0 : index
      %c0_157 = arith.constant 0 : index
      %203 = vector.load %arg7[%c0_156, %c0_157] : memref<1x32xf32, #tpu.memory_space<vmem>>, vector<1x32xf32>
      %204 = vector.broadcast %203 : vector<1x32xf32> to vector<8x32xf32>
      %205 = arith.addf %202, %204 : vector<8x32xf32>
      %c0_158 = arith.constant 0 : index
      %c0_159 = arith.constant 0 : index
      %c0_160 = arith.constant 0 : index
      %206 = vector.load %arg8[%c0_158, %c0_159, %c0_160] : memref<1x8x32xf32, #tpu.memory_space<vmem>>, vector<1x8x32xf32>
      %207 = vector.shape_cast %206 : vector<1x8x32xf32> to vector<8x32xf32>
      %208 = vector.shape_cast %205 : vector<8x32xf32> to vector<1x8x32xf32>
      tpu.vector_store %arg8[%c0_158, %c0_159, %c0_160], %208 {strides = array<i32>} : memref<1x8x32xf32, #tpu.memory_space<vmem>>, vector<1x8x32xf32>,
    } else {
    }
    return
  }
  func.func @transform_0(%arg0: i32, %arg1: i32, %arg2: i32) -> (i32, i32, i32) {
    %c0_i32 = arith.constant 0 : i32
    %c0_i32_0 = arith.constant 0 : i32
    return %arg0, %arg1, %c0_i32 : i32, i32, i32
  }
  func.func @transform_1(%arg0: i32, %arg1: i32, %arg2: i32) -> (i32, i32, i32) {
    %c0_i32 = arith.constant 0 : i32
    %c0_i32_0 = arith.constant 0 : i32
    return %arg0, %arg2, %c0_i32 : i32, i32, i32
  }
  func.func @transform_2(%arg0: i32, %arg1: i32, %arg2: i32) -> (i32, i32, i32) {
    %c0_i32 = arith.constant 0 : i32
    %c0_i32_0 = arith.constant 0 : i32
    return %arg0, %arg2, %c0_i32 : i32, i32, i32
  }
  func.func @transform_3(%arg0: i32, %arg1: i32, %arg2: i32) -> (i32, i32) {
    %c0_i32 = arith.constant 0 : i32
    %c0_i32_0 = arith.constant 0 : i32
    %c0_i32_1 = arith.constant 0 : i32
    return %c0_i32, %c0_i32_0 : i32, i32
  }
  func.func @transform_4(%arg0: i32, %arg1: i32, %arg2: i32) -> (i32, i32) {
    %c0_i32 = arith.constant 0 : i32
    %c0_i32_0 = arith.constant 0 : i32
    %c0_i32_1 = arith.constant 0 : i32
    return %c0_i32, %c0_i32_0 : i32, i32
  }
  func.func @transform_5(%arg0: i32, %arg1: i32, %arg2: i32) -> (i32, i32, i32) {
    %c0_i32 = arith.constant 0 : i32
    %c0_i32_0 = arith.constant 0 : i32
    return %arg0, %arg1, %c0_i32 : i32, i32, i32
  }
}

</mosaic_0001>

<bundles_post_ra>
// kernel: tpu_custom_call.1
= control target key start
LH: loop header
LB: loop body
LE: loop exit
PB: predicated region body
PF: predicated region fallthrough
CT: control target
= control target key end

     0   :  { %s1796_s0 = inlined_call_operand.hbm [shape: bf16[2,8,32], index: 0, kind: input, shape index: {}]   ;;  %s1797_s1 = inlined_call_operand.hbm [shape: bf16[2,8,32], index: 1, kind: input, shape index: {}]   ;;  %s1798_s2 = inlined_call_operand.hbm [shape: bf16[2,8,32], index: 2, kind: input, shape index: {}]   ;;  %s1799_s3 = inlined_call_operand.hbm [shape: bf16[32,32], index: 3, kind: input, shape index: {}]   ;;  %s1800_s4 = inlined_call_operand.vmem [shape: f32[1,32], index: 4, kind: input, shape index: {}]   ;;  %s1801_s5 = inlined_call_operand.hbm [shape: f32[2,8,32], index: 5, kind: output, shape index: {}]  }
   0x1   :  { %1808 = sst [smem:[#allocation23_spill]] %s1797_s1 }
   0x2   :  { %1809 = sst [smem:[#allocation24_spill]] %s1799_s3 }
   0x3   :  { %10 = vsyncpa [#allocation6], 0 }
   0x4   :  { %12 = vsyncpa [#allocation6 + $0x1], 0 }
   0x5   :  { %13 = vsyncpa [#allocation9], 0 }
   0x6   :  { %15 = vsyncpa [#allocation9 + $0x1], 0 }
   0x7   :  { %16 = vsyncpa [#allocation12], 0 }
   0x8   :  { %17 = vsyncpa [#allocation7], 0 }
   0x9   :  { %19 = vsyncpa [#allocation7 + $0x1], 0  ;;  %s1482_s18 = smov 0   ;;  %s1484_s19 = smov 0  }
   0xa   :  { %s1486_s20 = smov 0   ;;  %s1488_s21 = smov 0  }
   0xb   :  { %s1490_s22 = smov 0   ;;  %s1492_s23 = smov 0  }
   0xc LB: > { %1810 = sst [smem:[#allocation18_spill]] %s1437_s22  ;;  %s1513_s24 = sadd.s32 4294967295, %s1441_s23   ;;  %s1441_s23 = sphi %s1492_s23, %s25_s23   ;;  %s1437_s22 = sphi %s1490_s22, %s1828_s22   ;;  %s1433_s21 = sphi %s1488_s21, %s1827_s21   ;;  %s1429_s20 = sphi %s1486_s20, %s1831_s20   ;;  %s1425_s19 = sphi %s1484_s19, %s1830_s19   ;;  %s1421_s18 = sphi %s1482_s18, %s1829_s18  }
   0xd   : > { %1811 = sst [smem:[#allocation19_spill]] %s1441_s23  ;;  %s1080_s25 = sadd.s32 4294967294, %s1441_s23  }
   0xe   : > { %s44_s26 = sadd.s32 1, %s1437_s22  ;;  %s53_s27 = sadd.s32 1, %s1429_s20 }
   0xf   : > { %p46_p0 = scmp.ge.s32.totalorder %s44_s26, 2  ;;  %p60_p1 = scmp.ne.s32.totalorder %s1429_s20, %s1425_s19 }
  0x10   : > { %p61_p2 = scmp.eq.s32.totalorder %s1441_s23, 0  ;;  %p66_p3 = scmp.ne.s32.totalorder %s1425_s19, %s1421_s18 }
  0x11   : > { %s1833_s26 = smov (%p46_p0, %s44_s26), 0  ;;  %p190_p5 = scmp.eq.s32.totalorder %s1513_s24, 1 }
  0x12   : > { %1812 = sst [smem:[#allocation20_spill]] %s1833_s26  ;;  %p1525_p4 = por %p61_p2, %p60_p1 }
  0x13   : > { %s48_s29 = ssub.s32 %s1437_s22, %s1833_s26  ;;  %p196_p6 = scmp.eq.s32.totalorder %s1080_s25, 1 }
  0x14   : > { %p51_p7 = scmp.eq.s32.totalorder %s48_s29, 0  ;;  %p1532_p8 = por %p190_p5, %p60_p1 }
  0x15   : > { %p1539_p9 = por %p196_p6, %p66_p3  ;;  %p1083_p10 = scmp.ge.s32.totalorder %s1441_s23, 2 }
  0x16   : > { %s1544_s7 = scalar_select %p51_p7, %s1429_s20, %s53_s27  }
  0x17   : > { %s1815_s6 = scalar_select %p1539_p9, 1, 0 }
  0x18   : > { %1817 = sst [smem:[#allocation22_spill]] %s1544_s7  ;;  %p1143_p11 = scmp.lt.s32.totalorder %s1441_s23, 2 }
  0x19   : > { %1816 = sst [smem:[#allocation21_spill]] %s1815_s6  ;;  %s1802_s8 = sand.u32 1, %s1429_s20  }
  0x1a   : > { %s1550_s9 = sshll.u32 %s1437_s22, 2  ;;  %s1554_s10 = sshll.u32 %s1802_s8, 2 }
  0x1b   : > { %p1558_p12 = pnand %p1143_p11, %p1525_p4  ;;  %s253_s12 = sand.u32 1, %s1441_s23  }
  0x1c   : > { %s1819_s1 = sld [smem:[#allocation23_spill]]  ;;  %s257_s16 = scalar_lea.vmem [#allocation8], %s1554_s10 }
  0x1d   : > { %s266_s17 = sshll.u32 %s257_s16, 4  ;;  %s1568_s27 = scalar_lea.sflag [#allocation9], %s253_s12  ;;  %s267_s17 = int_to_ptr.vmem [resolvable:$true] %s266_s17 }
  0x1e   : > { %p67_p13 = scmp.eq.s32.totalorder %s1513_s24, 0  ;;  %p1081_p0 = scmp.ge.s32.totalorder %s1441_s23, 1 }
  0x1f   : > { %p203_p1 = scmp.lt.s32.totalorder %s1441_s23, 3  ;;  %s1821_s3 = sld [smem:[#allocation24_spill]] }
  0x20   : > { %p1581_p2 = por %p67_p13, %p66_p3  ;;  %s242_s29 = scalar_lea.hbm %s1796_s0, %s1550_s9 }
  0x21   : > { %p1588_p4 = pnand %p1081_p0, %p203_p1  ;;  %s244_s13 = sshll.u32 %s242_s29, 4  ;;  %s245_s13 = int_to_ptr.hbm [resolvable:$true] %s244_s13 }
  0x22   : > { %s262_s15 = scalar_lea.hbm %s1819_s1, %s1550_s9  ;;  %s1444_s8 = smov 64  }
  0x23   : > { %s264_s25 = sshll.u32 %s262_s15, 4  ;;  %p1124_p5 = pneg %p1588_p4  ;;  %s265_s25 = int_to_ptr.hbm [resolvable:$true] %s264_s25 }
  0x24   : > { %1134 = dma.hbm_to_vmem [thread:$0]  (!%p1558_p12), %s265_s25, 64, %s267_s17, %s1568_s27  }
  0x25   : > { %s214_s14 = sshll.u32 %s1821_s3, 4  ;;  %s1443_s15 = smov [#allocation11]   ;;  %s215_s14 = int_to_ptr.hbm [resolvable:$true] %s214_s14 }
  0x26   : > { %s216_s16 = sshll.u32 %s1443_s15, 4  ;;  %p1125_p3 = pnand %p1124_p5, %p67_p13  ;;  %s217_s16 = int_to_ptr.vmem [resolvable:$true] %s216_s16 }
  0x27   : > { %s1445_s1 = smov 4   ;;  %s237_s3 = scalar_lea.vmem [#allocation5], %s1554_s10 }
  0x28   : > { %1127 = dma.hbm_to_vmem [thread:$0]  (!%p1125_p3), %s215_s14, 256, %s217_s16, [#allocation12], %s1444_s8, %s1444_s8, %s1445_s1  }
  0x29   : > { %s246_s26 = sshll.u32 %s237_s3, 4  ;;  %s1823_s22 = sand.u32 1, %s1429_s20   ;;  %s247_s26 = int_to_ptr.vmem [resolvable:$true] %s246_s26 }
  0x2a   : > { %s234_s7 = scalar_lea.sflag [#allocation6], %s1823_s22  ;;  %s282_s6 = scalar_lea.hbm %s1798_s2, %s1550_s9 }
  0x2b   : > { %1131 = dma.hbm_to_vmem [thread:$0]  (!%p1558_p12), %s245_s13, 64, %s247_s26, %s234_s7  }
  0x2c   : > { %s277_s17 = scalar_lea.vmem [#allocation10], %s1554_s10  ;;  %s284_s29 = sshll.u32 %s282_s6, 4  ;;  %s285_s29 = int_to_ptr.hbm [resolvable:$true] %s284_s29 }
  0x2d   : > { %s286_s25 = sshll.u32 %s277_s17, 4  ;;  %295 = sbr.rel (%p1588_p4) target bundleno = 1219 (0x4c3), region = 40  ;;  %s287_s25 = int_to_ptr.vmem [resolvable:$true] %s286_s25 }
  0x2e   : > { %1137 = dma.hbm_to_vmem [thread:$0]  (!%p1558_p12), %s285_s29, 64, %s287_s25, %s1568_s27  }
  0x2f   : > { %s1616_s1 = sand.u32 (!%p1588_p4), 1, %s1425_s19  }
  0x30   : > { %s1091_s3 = sshll.u32 (!%p1588_p4), %s1616_s1, 2  ;;  %s298_s22 = scalar_lea.sflag (!%p1588_p4), [#allocation6], %s1616_s1 }
  0x31   : > { %s1620_s23 = scalar_lea.vmem (!%p1588_p4), [#allocation5], %s1091_s3 }
  0x32   : > { %1404 = dma.done.wait (%p1581_p2), %s298_s22, 64  }
  0x33   : > { %1406 = vsyncadd (%p1581_p2), %s298_s22, 4294967232  ;;  %s307_s26 = sand.u32 1, %s1513_s24   ;;  %s1627_s7 = scalar_lea.vmem [#allocation8], %s1091_s3 }
  0x34   : > { %s308_s6 = scalar_lea.sflag [#allocation9], %s307_s26 }
  0x35   : > { %1408 = dma.done.wait (%p1581_p2), %s308_s6, 128  }
  0x36   : > { %1410 = vsyncadd (%p1581_p2), %s308_s6, 4294967168  ;;  %s1633_s8 = scalar_lea.vmem [#allocation10], %s1091_s3 }
  0x37   : > { %1412 = dma.done.wait (%p67_p13), [#allocation12], 256  }
  0x38   : > { %1414 = vsyncadd (%p67_p13), [#allocation12], 4294967040  ;;  %vm378_vm0 = vcmask 64512   ;;  %v384_v0 = vld [vmem:[%s1627_s7] sm:$0xf]  ;;  %vm369_vm1 = vcmask 7168  }
  0x39   : > { %v391_v1 = vsel %vm378_vm0, %v384_v0, 0  ;;  %v383_v2 = vld [vmem:[%s1620_s23] sm:$0xf]  ;;  %v1446_v3 = vmov -inf   ;;  %v462_v7 = vld [vmem:[%s1627_s7] sm:$0xf] }
  0x3a   : > { %400 = vmatpush.bf16.xpose.msra.mxu0 %v391_v1  ;;  %370 = vst.msk [vmem:[#allocation2] sm:$0xff] %vm369_vm1, %v1446_v3  ;;  %v470_v8 = vunpack.c.l.b16 %v462_v7  ;;  %v1447_v10 = vmov 0   ;;  %s1448_s24 = smov 120   ;;  %v1449_v11 = vmov 0.0   ;;  %v648_v12 = vld [vmem:[%s1627_s7] sm:$0xf] }
  0x3b   : > { %371 = vst.msk [vmem:[#allocation2 + $0x8] sm:$0xff] %vm369_vm1, %v1446_v3  ;;  %1203 = vset.pattern.permute.xlu1 %v1447_v10  ;;  %1204 = vset.pattern.permute.xlu2 %v1447_v10  ;;  %v656_v13 = vunpack.c.l.b16 %v648_v12  ;;  %v555_v14 = vld [vmem:[%s1627_s7] sm:$0xf]  ;;  %s1450_s9 = smov 104   ;;  %v554_v18 = vld [vmem:[%s1620_s23] sm:$0xf] }
  0x3c   : > { %372 = vst.msk [vmem:[#allocation2 + $0x10] sm:$0xff] %vm369_vm1, %v1446_v3  ;;  %v471_v9 = vpack.c.b16 %v470_v8, %v470_v8  ;;  %1205 = vset.pattern.permute.xlu0 %v1447_v10  ;;  %v563_v16 = vunpack.c.l.b16 %v555_v14  ;;  %v461_v21 = vld [vmem:[%s1620_s23] sm:$0xf]  ;;  %s1451_s10 = smov 112   ;;  %v558_v22 = vunpack.c.l.b16 %v554_v18  ;;  %v385_v35 = vld [vmem:[%s1633_s8] sm:$0xf] }
  0x3d   : > { %373 = vst.msk [vmem:[#allocation2 + $0x18] sm:$0xff] %vm369_vm1, %v1446_v3  ;;  %v657_v15 = vpack.c.b16 %v656_v13, %v656_v13  ;;  %v465_v25 = vunpack.c.l.b16 %v461_v21  ;;  %v647_v28 = vld [vmem:[%s1620_s23] sm:$0xf]  ;;  %vm441_vm2 = vcmask 1043456   ;;  %v463_v57 = vld [vmem:[%s1633_s8] sm:$0xf] }
  0x3e   : > { %374 = vst.msk [vmem:[#allocation3] sm:$0xff] %vm369_vm1, %v1449_v11  ;;  %v564_v17 = vpack.c.b16 %v563_v16, %v563_v16  ;;  %v559_v26 = vpack.c.b16 %v558_v22, %v558_v22  ;;  %v651_v29 = vunpack.c.l.b16 %v647_v28  ;;  %v443_v36 = vsel %vm441_vm2, %v385_v35, 0  ;;  %v649_v61 = vld [vmem:[%s1633_s8] sm:$0xf]  ;;  %s1095_s11 = sshll.u32 %s1616_s1, 3  ;;  %s1109_s27 = sshll.u32 %s1433_s21, 3 }
  0x3f   : > { %375 = vst.msk [vmem:[#allocation3 + $0x8] sm:$0xff] %vm369_vm1, %v1449_v11  ;;  %658 = vrot.lane.b32.xlu2 %v657_v15, %s1450_s9  ;;  %v466_v27 = vpack.c.b16 %v465_v25, %v465_v25  ;;  %452 = vmatpush.bf16.msra.mxu1 %v443_v36  ;;  %v528_v58 = vunpack.c.l.b16 %v463_v57  ;;  %v714_v62 = vunpack.c.l.b16 %v649_v61  ;;  %s936_s12 = scalar_lea.hbm %s1801_s5, %s1109_s27  ;;  %s363_s15 = scalar_lea.vmem [#allocation13], %s1095_s11 }
  0x40   : > { %376 = vst.msk [vmem:[#allocation3 + $0x10] sm:$0xff] %vm369_vm1, %v1449_v11  ;;  %v652_v30 = vpack.c.b16 %v651_v29, %v651_v29  ;;  %s938_s17 = sshll.u32 %s363_s15, 4  ;;  %s940_s25 = sshll.u32 %s936_s12, 4  ;;  %s939_s17 = int_to_ptr.vmem [resolvable:$true] %s938_s17  ;;  %s941_s25 = int_to_ptr.hbm [resolvable:$true] %s940_s25 }
  0x41   : > { %1096 = vmatmul.msk.bf16.vlgmr.msra.gmra.mxu0 %vm378_vm0, %v383_v2  ;;  %377 = vst.msk [vmem:[#allocation3 + $0x18] sm:$0xff] %vm369_vm1, %v1449_v11  ;;  %v1665_v19 = vld [vmem:[#allocation2] sm:$0xff]  ;;  %v529_v59 = vpack.c.b16 %v528_v58, %v528_v58  ;;  %v715_v63 = vpack.c.b16 %v714_v62, %v714_v62  ;;  %s925_s21 = scalar_lea.sflag [#allocation7], %s1616_s1  ;;  %s1365_s29 = sshra.s32 %s941_s25, 4  ;;  %s1366_s29 = int_to_ptr.hbm [resolvable:$true] %s1365_s29 }
  0x42   : > { %379 = vst.msk [vmem:[#allocation4] sm:$0xff] %vm378_vm0, %v1449_v11  ;;  %v1704_v1 = vld [vmem:[#allocation2 + $0x8] sm:$0xff]  ;;  %s1367_s3 = scalar_lea.hbm %s1366_s29, 8  ;;  %s1371_s26 = scalar_lea.hbm %s1801_s5, 16 }
  0x43   : > { %380 = vst.msk [vmem:[#allocation4 + $0x8] sm:$0xff] %vm378_vm0, %v1449_v11  ;;  %p1368_p6 = scmp.ne.s32.totalorder %s1366_s29, %s1367_s3  ;;  %p1372_p12 = scmp.lt.s32.totalorder %s1366_s29, %s1801_s5 }
  0x44   : > { %381 = vst.msk [vmem:[#allocation4 + $0x10] sm:$0xff] %vm378_vm0, %v1449_v11  ;;  %v680_v3 = vld [vmem:[#allocation2 + $0x18] sm:$0xff]  ;;  %p1373_p13 = scmp.lt.s32.totalorder %s1371_s26, %s1367_s3 }
  0x45   : > { %382 = vst.msk [vmem:[#allocation4 + $0x18] sm:$0xff] %vm378_vm0, %v1449_v11  ;;  %v556_v11 = vld [vmem:[%s1633_s8] sm:$0xf]  ;;  %v422_v22 = vld [vmem:[#allocation3] sm:$0xff]  ;;  %p1369_p7 = pnand %p1368_p6, %p1532_p8 }
  0x46   : > { %v621_v14 = vunpack.c.l.b16 %v556_v11  ;;  %p1374_p0 = por %p1373_p13, %p1372_p12 }
  0x47   : > { %565 = vrot.lane.b32.xlu2 %v564_v17, %s1451_s10  ;;  %p1370_p11 = pneg %p1369_p7 }
  0x48   : > { %v622_v15 = vpack.c.b16 %v621_v14, %v621_v14 }
  0x49   : > { %p1375_p1 = pnand %p1374_p0, %p1370_p11 }
  0x4f   : > { %560 = vrot.lane.b32.xlu2 %v559_v26, %s1451_s10 }
  0x99   : > { %v659_v33 = vpop.permute.xlu2 %658 }
  0x9a   : > { %v664_v34 = vsel %vm378_vm0, %v659_v33, 0 }
  0x9b   : > { %673 = vmatpush.bf16.xpose.msrb.mxu0 %v664_v34 }
  0xa1   : > { %v566_v37 = vpop.permute.xlu2 %565 }
  0xa2   : > { %v571_v38 = vsel %vm378_vm0, %v566_v37, 0 }
  0xa3   : > { %580 = vmatpush.bf16.xpose.msrb.mxu1 %v571_v38 }
  0xa9   : > { %v561_v46 = vpop.permute.xlu2 %560 }
  0xbe   : > { %v1647_v4 = vpop.f32.mrf.mxu0 }
  0xbf   : > { %v407_v5 = vsel %vm378_vm0, %v1647_v4, -inf }
  0xc0   : > { %408 = vmax.xlane.f32.xlu0 %v407_v5 }
  0xc6   : > { %v404_v6 = vpop.f32.mrf.mxu0 }
  0xd4   : > { %472 = vrot.lane.b32.xlu0 %v471_v9, %s1448_s24  ;;  %v587_v9 = vld [vmem:[#allocation2 + $0x10] sm:$0xff] }
 0x133   : > { %v409_v20 = vpop.xlane.xlu0 %408 }
 0x134   : > { %v1670_v23 = vmax.f32 %v1665_v19, %v409_v20 }
 0x136   : > { %v411_v24 = vsub.f32 %v1665_v19, %v1670_v23  ;;  %460 = vst.msk [vmem:[#allocation2] sm:$0xff] %vm369_vm1, %v1670_v23  ;;  %416 = vperm.xlu1 %1203, %v1670_v23  }
 0x138   : > { %v412_v17 = vmul.f32 1.442695, %v411_v24 }
 0x13e   : > { %467 = vrot.lane.b32.xlu1 %v466_v27, %s1448_s24 }
 0x146   : > { %653 = vrot.lane.b32.xlu1 %v652_v30, %s1450_s9  ;;  %v473_v31 = vpop.permute.xlu0 %472 }
 0x147   : > { %v478_v32 = vsel %vm378_vm0, %v473_v31, 0 }
 0x148   : > { %487 = vmatpush.bf16.xpose.msra.mxu2 %v478_v32 }
 0x1a8   : > { %v417_v39 = vpop.permute.xlu1 %416 }
 0x1a9   : > { %v419_v40 = vsub.f32 %v1647_v4, %v417_v39 }
 0x1ab   : > { %v420_v41 = vmul.f32 1.442695, %v419_v40 }
 0x1ad   : > { %1207 = vpow2.f32 %v420_v41 }
 0x1ae   : > { %1209 = vpow2.f32 %v412_v17 }
 0x1b0   : > { %v468_v42 = vpop.permute.xlu1 %467 }
 0x1b1   : > { %1098 = vmatmul.msk.bf16.vlgmr.msra.gmra.mxu2 %vm378_vm0, %v468_v42 }
 0x1b3   : > { %v1208_v43 = vpop.eup %1207 }
 0x1b4   : > { %v437_v44 = vpack.c.bf16 %v1208_v43, %v1208_v43  ;;  %v424_v0 = vsel %vm378_vm0, %v1208_v43, 0.0  ;;  %v1210_v21 = vpop.eup %1209 }
 0x1b5   : > { %v423_v25 = vmul.f32 %v1210_v21, %v422_v22 }
 0x1b6   : > { %1097 = vmatmul.msk.bf16.vlgmr.msra.gmra.mxu1 %vm378_vm0, %v437_v44 }
 0x1b8   : > { %v654_v45 = vpop.permute.xlu1 %653 }
 0x1b9   : > { %1102 = vmatmul.msk.bf16.vlgmr.msrb.gmra.mxu0 %vm378_vm0, %v654_v45 }
 0x1c6   : > { %1100 = vmatmul.msk.bf16.vlgmr.msrb.gmra.mxu1 %vm378_vm0, %v561_v46 }
 0x233   : > { %v1691_v47 = vpop.f32.mrf.mxu1 }
 0x234   : > { %v489_v48 = vpop.f32.mrf.mxu2 }
 0x235   : > { %v495_v49 = vsel %vm378_vm0, %v489_v48, -inf }
 0x236   : > { %496 = vmax.xlane.f32.xlu1 %v495_v49  ;;  %v1694_v50 = vpop.f32.mrf.mxu0 }
 0x237   : > { %v681_v51 = vsel %vm378_vm0, %v1694_v50, -inf }
 0x238   : > { %682 = vmax.xlane.f32.xlu2 %v681_v51 }
 0x23b   : > { %v456_v52 = vpop.f32.mrf.mxu1 }
 0x23c   : > { %v491_v53 = vpop.f32.mrf.mxu2 }
 0x23e   : > { %v677_v54 = vpop.f32.mrf.mxu0 }
 0x23f   : > { %v511_v54 = vld [vmem:[#allocation3 + $0x8] sm:$0xff] }
 0x243   : > { %v582_v55 = vpop.f32.mrf.mxu1 }
 0x244   : > { %v588_v56 = vsel %vm378_vm0, %v582_v55, -inf }
 0x245   : > { %589 = vmax.xlane.f32.xlu0 %v588_v56 }
 0x24b   : > { %v584_v60 = vpop.f32.mrf.mxu1 }
 0x24f   : > { %530 = vrot.lane.b32.xlu1 %v529_v59, %s1448_s24  ;;  %v604_v59 = vld [vmem:[#allocation3 + $0x10] sm:$0xff] }
 0x257   : > { %716 = vrot.lane.b32.xlu1 %v715_v63, %s1450_s9 }
 0x281   : > { %425 = vadd.xlane.f32.xlu1 %v424_v0  ;;  %v430_v0 = vld [vmem:[#allocation4] sm:$0xff] }
 0x2a9   : > { %v497_v2 = vpop.xlane.xlu1 %496 }
 0x2aa   : > { %v1707_v4 = vmax.f32 %v1704_v1, %v497_v2  ;;  %v766_v2 = vld [vmem:[#allocation11] sm:$0xf] }
 0x2ab   : > { %v683_v5 = vpop.xlane.xlu2 %682 }
 0x2ac   : > { %v499_v6 = vsub.f32 %v1704_v1, %v1707_v4  ;;  %553 = vst.msk [vmem:[#allocation2 + $0x8] sm:$0xff] %vm369_vm1, %v1707_v4  ;;  %v684_v7 = vmax.f32 %v680_v3, %v683_v5  ;;  %504 = vperm.xlu2 %1204, %v1707_v4   ;;  %v814_v4 = vsel %vm441_vm2, %v766_v2, 0 }
 0x2ae   : > { %v685_v8 = vsub.f32 %v680_v3, %v684_v7  ;;  %739 = vst.msk [vmem:[#allocation2 + $0x18] sm:$0xff] %vm369_vm1, %v684_v7  ;;  %690 = vperm.xlu0 %1205, %v684_v7   ;;  %v500_v52 = vmul.f32 1.442695, %v499_v6  ;;  %v697_v6 = vld [vmem:[#allocation3 + $0x18] sm:$0xff] }
 0x2b0   : > { %v686_v43 = vmul.f32 1.442695, %v685_v8 }
 0x2b8   : > { %v590_v10 = vpop.xlane.xlu0 %589 }
 0x2b9   : > { %v591_v12 = vmax.f32 %v587_v9, %v590_v10 }
 0x2bb   : > { %v592_v13 = vsub.f32 %v587_v9, %v591_v12  ;;  %646 = vst.msk [vmem:[#allocation2 + $0x10] sm:$0xff] %vm369_vm1, %v591_v12  ;;  %597 = vperm.xlu2 %1204, %v591_v12  }
 0x2bd   : > { %v593_v45 = vmul.f32 1.442695, %v592_v13  ;;  %v612_v13 = vld [vmem:[#allocation4 + $0x10] sm:$0xff] }
 0x2c1   : > { %v531_v16 = vpop.permute.xlu1 %530 }
 0x2c2   : > { %v536_v20 = vsel %vm441_vm2, %v531_v16, 0 }
 0x2c3   : > { %623 = vrot.lane.b32.xlu2 %v622_v15, %s1451_s10  ;;  %545 = vmatpush.bf16.msra.mxu3 %v536_v20 }
 0x2c9   : > { %v717_v18 = vpop.permute.xlu1 %716 }
 0x2ca   : > { %v722_v30 = vsel %vm441_vm2, %v717_v18, 0 }
 0x2cb   : > { %731 = vmatpush.bf16.msrb.mxu2 %v722_v30 }
 0x2f4   : > { %v426_v26 = vpop.xlane.xlu1 %425 }
 0x2f5   : > { %v427_v27 = vadd.f32 %v426_v26, %v423_v25 }
 0x2f7   : > { %429 = vst.msk [vmem:[#allocation3] sm:$0xff] %vm369_vm1, %v427_v27 }
 0x2fe   : > { %v744_v51 = vld [vmem:[#allocation3] sm:$0xff] }
 0x306   : > { %v505_v28 = vpop.permute.xlu2 %504 }
 0x307   : > { %v507_v29 = vsub.f32 %v489_v48, %v505_v28 }
 0x309   : > { %v508_v31 = vmul.f32 1.442695, %v507_v29 }
 0x30b   : > { %1211 = vpow2.f32 %v508_v31 }
 0x311   : > { %v1212_v19 = vpop.eup %1211 }
 0x312   : > { %v513_v23 = vsel %vm378_vm0, %v1212_v19, 0.0  ;;  %v526_v24 = vpack.c.bf16 %v1212_v19, %v1212_v19 }
 0x313   : > { %514 = vadd.xlane.f32.xlu0 %v513_v23 }
 0x314   : > { %1099 = vmatmul.msk.bf16.vlgmr.msra.gmra.mxu3 %vm378_vm0, %v526_v24 }
 0x315   : > { %v598_v32 = vpop.permute.xlu2 %597 }
 0x316   : > { %v600_v33 = vsub.f32 %v582_v55, %v598_v32 }
 0x318   : > { %v601_v34 = vmul.f32 1.442695, %v600_v33 }
 0x31a   : > { %1213 = vpow2.f32 %v601_v34 }
 0x31d   : > { %v624_v35 = vpop.permute.xlu2 %623 }
 0x31e   : > { %v629_v36 = vsel %vm441_vm2, %v624_v35, 0 }
 0x31f   : > { %638 = vmatpush.bf16.msrb.mxu3 %v629_v36 }
 0x320   : > { %v1214_v37 = vpop.eup %1213  ;;  %v691_v38 = vpop.permute.xlu0 %690 }
 0x321   : > { %v693_v39 = vsub.f32 %v1694_v50, %v691_v38  ;;  %v606_v40 = vsel %vm378_vm0, %v1214_v37, 0.0  ;;  %v619_v41 = vpack.c.bf16 %v1214_v37, %v1214_v37  ;;  %v790_v38 = vld [vmem:[#allocation11 + $0x4] sm:$0xf] }
 0x322   : > { %607 = vadd.xlane.f32.xlu1 %v606_v40 }
 0x323   : > { %v694_v42 = vmul.f32 1.442695, %v693_v39  ;;  %823 = vmatpush.bf16.msra.mxu3 %v814_v4  ;;  %v795_v39 = vsel %vm441_vm2, %v790_v38, 0 }
 0x324   : > { %1101 = vmatmul.msk.bf16.vlgmr.msrb.gmra.mxu3 %vm378_vm0, %v619_v41  ;;  %804 = vmatpush.bf16.msra.mxu1 %v795_v39  ;;  %v519_v41 = vld [vmem:[#allocation4 + $0x8] sm:$0xff] }
 0x325   : > { %1215 = vpow2.f32 %v694_v42 }
 0x326   : > { %1217 = vpow2.f32 %v686_v43 }
 0x327   : > { %433 = vperm.xlu0 %1205, %v1210_v21   ;;  %1219 = vpow2.f32 %v593_v45 }
 0x328   : > { %1221 = vpow2.f32 %v500_v52 }
 0x32b   : > { %v1216_v44 = vpop.eup %1215 }
 0x32c   : > { %v699_v46 = vsel %vm378_vm0, %v1216_v44, 0.0  ;;  %v712_v48 = vpack.c.bf16 %v1216_v44, %v1216_v44  ;;  %v1218_v49 = vpop.eup %1217 }
 0x32d   : > { %700 = vadd.xlane.f32.xlu2 %v699_v46  ;;  %v1220_v50 = vpop.eup %1219  ;;  %v698_v8 = vmul.f32 %v1218_v49, %v697_v6 }
 0x32e   : > { %1103 = vmatmul.msk.bf16.vlgmr.msrb.gmra.mxu2 %vm378_vm0, %v712_v48  ;;  %v1222_v53 = vpop.eup %1221  ;;  %v605_v60 = vmul.f32 %v1220_v50, %v604_v59  ;;  %v896_v59 = vld [vmem:[#allocation11 + $0xc] sm:$0xf] }
 0x32f   : > { %708 = vperm.xlu0 %1205, %v1218_v49   ;;  %v512_v55 = vmul.f32 %v1222_v53, %v511_v54 }
 0x337   : > { %615 = vperm.xlu0 %1205, %v1220_v50  }
 0x345   : > { %747 = vperm.xlu2 %1204, %v744_v51  }
 0x386   : > { %v515_v56 = vpop.xlane.xlu0 %514 }
 0x387   : > { %v516_v57 = vadd.f32 %v515_v56, %v512_v55 }
 0x389   : > { %517 = vst.msk [vmem:[#allocation3 + $0x8] sm:$0xff] %vm369_vm1, %v516_v57 }
 0x390   : > { %v768_v58 = vld [vmem:[#allocation3 + $0x8] sm:$0xff] }
 0x391   : > { %771 = vperm.xlu2 %1204, %v768_v58  }
 0x395   : > { %v608_v61 = vpop.xlane.xlu1 %607 }
 0x396   : > { %v609_v62 = vadd.f32 %v608_v61, %v605_v60  ;;  %v901_v60 = vsel %vm441_vm2, %v896_v59, 0  ;;  %v852_v61 = vld [vmem:[#allocation11 + $0x8] sm:$0xf] }
 0x397   : > { %v1736_v63 = vpop.f32.mrf.mxu3  ;;  %910 = vmatpush.bf16.msra.mxu2 %v901_v60 }
 0x398   : > { %610 = vst.msk [vmem:[#allocation3 + $0x10] sm:$0xff] %vm369_vm1, %v609_v62  ;;  %v857_v62 = vsel %vm441_vm2, %v852_v61, 0 }
 0x399   : > { %v434_v1 = vpop.permute.xlu0 %433  ;;  %522 = vperm.xlu2 %1204, %v1222_v53   ;;  %866 = vmatpush.bf16.msra.mxu0 %v857_v62 }
 0x39a   : > { %v436_v3 = vmul.f32 %v434_v1, %v430_v0 }
 0x39c   : > { %v458_v5 = vadd.f32 %v1691_v47, %v436_v3  ;;  %v705_v47 = vld [vmem:[#allocation4 + $0x18] sm:$0xff] }
 0x39e   : > { %459 = vst.msk [vmem:[#allocation4] sm:$0xff] %vm378_vm0, %v458_v5 }
 0x39f   : > { %v549_v7 = vpop.f32.mrf.mxu3  ;;  %v830_v29 = vld [vmem:[#allocation3 + $0x10] sm:$0xff] }
 0x3a0   : > { %v701_v9 = vpop.xlane.xlu2 %700 }
 0x3a1   : > { %v702_v10 = vadd.f32 %v701_v9, %v698_v8  ;;  %v709_v11 = vpop.permute.xlu0 %708 }
 0x3a2   : > { %v711_v22 = vmul.f32 %v709_v11, %v705_v47 }
 0x3a3   : > { %703 = vst.msk [vmem:[#allocation3 + $0x18] sm:$0xff] %vm369_vm1, %v702_v10 }
 0x3a5   : > { %v743_v33 = vld [vmem:[#allocation4] sm:$0xff] }
 0x3a7   : > { %v640_v12 = vpop.f32.mrf.mxu3 }
 0x3a8   : > { %v748_v14 = vpop.permute.xlu2 %747 }
 0x3a9   : > { %1223 = vrcp.f32 %v748_v14  ;;  %v616_v15 = vpop.permute.xlu0 %615  ;;  %v761_v30 = vand.u32 2147483648, %v748_v14  ;;  %v759_v19 = vand.u32 2147483647, %v748_v14  ;;  %vm755_vm4 = vweird.f32 %v748_v14 }
 0x3aa   : > { %v618_v16 = vmul.f32 %v616_v15, %v612_v13  ;;  %v874_v17 = vld [vmem:[#allocation3 + $0x18] sm:$0xff] }
 0x3ab   : > { %877 = vperm.xlu1 %1203, %v874_v17   ;;  %v762_v24 = vor.u32 1.1754944e-38, %v761_v30  ;;  %vm760_vm6 = vcmp.eq.f32.partialorder %v759_v19, 8.507059e+37 }
 0x3ac   : > { %v644_v18 = vadd.f32 %v640_v12, %v618_v16 }
 0x3ae   : > { %645 = vst.msk [vmem:[#allocation4 + $0x10] sm:$0xff] %vm378_vm0, %v644_v18 }
 0x3af   : > { %v1224_v20 = vpop.eup %1223  ;;  %v642_v21 = vpop.f32.mrf.mxu3 }
 0x3b0   : > { %v751_v25 = vmul.f32 %v1224_v20, %v748_v14  ;;  %vm756_vm3 = vweird.f32 %v1224_v20 }
 0x3b1   : > { %v733_v26 = vpop.f32.mrf.mxu2  ;;  %vm757_vm5 = vmor %vm755_vm4, %vm756_vm3 }
 0x3b2   : > { %v752_v27 = vsub.f32 1.0, %v751_v25  ;;  %v737_v28 = vadd.f32 %v733_v26, %v711_v22 }
 0x3b3   : > { %833 = vperm.xlu1 %1203, %v830_v29  }
 0x3b4   : > { %v753_v31 = vmul.f32 %v1224_v20, %v752_v27  ;;  %738 = vst.msk [vmem:[#allocation4 + $0x18] sm:$0xff] %vm378_vm0, %v737_v28 }
 0x3b5   : > { %v829_v25 = vld [vmem:[#allocation4 + $0x10] sm:$0xff] }
 0x3b6   : > { %v754_v23 = vadd.f32 %v1224_v20, %v753_v31 }
 0x3b8   : > { %v758_v32 = vsel %vm757_vm5, %v1224_v20, %v754_v23 }
 0x3b9   : > { %v763_v34 = vsel %vm760_vm6, %v762_v24, %v758_v32  ;;  %v735_v35 = vpop.f32.mrf.mxu2 }
 0x3ba   : > { %v764_v36 = vmul.f32 %v763_v34, %v743_v33  ;;  %v1206_v34 = vld [vmem:[%s1800_s4] ss:$0 sm:$0xff] }
 0x3bb   : > { %v873_v12 = vld [vmem:[#allocation4 + $0x18] sm:$0xff] }
 0x3bc   : > { %v765_v37 = vpack.c.bf16 %v764_v36, %v764_v36 }
 0x3be   : > { %1105 = vmatmul.msk.bf16.vlgmr.msra.gmra.mxu3 %vm378_vm0, %v765_v37 }
 0x3eb   : > { %v772_v40 = vpop.permute.xlu2 %771 }
 0x3ec   : > { %1225 = vrcp.f32 %v772_v40  ;;  %v785_v51 = vand.u32 2147483648, %v772_v40  ;;  %vm779_vm8 = vweird.f32 %v772_v40  ;;  %v783_v52 = vand.u32 2147483647, %v772_v40 }
 0x3ee   : > { %v786_v54 = vor.u32 1.1754944e-38, %v785_v51  ;;  %vm784_vm10 = vcmp.eq.f32.partialorder %v783_v52, 8.507059e+37 }
 0x3f2   : > { %v1226_v42 = vpop.eup %1225 }
 0x3f3   : > { %v775_v43 = vmul.f32 %v1226_v42, %v772_v40  ;;  %v523_v44 = vpop.permute.xlu2 %522  ;;  %vm780_vm7 = vweird.f32 %v1226_v42 }
 0x3f4   : > { %v525_v45 = vmul.f32 %v523_v44, %v519_v41  ;;  %vm781_vm9 = vmor %vm779_vm8, %vm780_vm7 }
 0x3f5   : > { %v776_v46 = vsub.f32 1.0, %v775_v43 }
 0x3f6   : > { %v551_v48 = vadd.f32 %v1736_v63, %v525_v45 }
 0x3f7   : > { %v777_v49 = vmul.f32 %v1226_v42, %v776_v46 }
 0x3f8   : > { %552 = vst.msk [vmem:[#allocation4 + $0x8] sm:$0xff] %vm378_vm0, %v551_v48 }
 0x3f9   : > { %v778_v50 = vadd.f32 %v1226_v42, %v777_v49 }
 0x3fb   : > { %v782_v53 = vsel %vm781_vm9, %v1226_v42, %v778_v50 }
 0x3fc   : > { %v787_v55 = vsel %vm784_vm10, %v786_v54, %v782_v53 }
 0x3ff   : > { %v767_v56 = vld [vmem:[#allocation4 + $0x8] sm:$0xff] }
 0x400   : > { %v788_v57 = vmul.f32 %v787_v55, %v767_v56 }
 0x402   : > { %v789_v58 = vpack.c.bf16 %v788_v57, %v788_v57 }
 0x404   : > { %1104 = vmatmul.msk.bf16.vlgmr.msra.gmra.mxu1 %vm378_vm0, %v789_v58 }
 0x41d   : > { %v878_v63 = vpop.permute.xlu1 %877 }
 0x41e   : > { %1227 = vrcp.f32 %v878_v63  ;;  %v891_v4 = vand.u32 2147483648, %v878_v63  ;;  %v889_v6 = vand.u32 2147483647, %v878_v63  ;;  %vm885_vm12 = vweird.f32 %v878_v63 }
 0x420   : > { %v892_v9 = vor.u32 1.1754944e-38, %v891_v4  ;;  %vm890_vm14 = vcmp.eq.f32.partialorder %v889_v6, 8.507059e+37 }
 0x424   : > { %v1228_v0 = vpop.eup %1227 }
 0x425   : > { %v881_v1 = vmul.f32 %v1228_v0, %v878_v63  ;;  %v834_v2 = vpop.permute.xlu1 %833  ;;  %vm886_vm11 = vweird.f32 %v1228_v0 }
 0x426   : > { %1229 = vrcp.f32 %v834_v2  ;;  %vm887_vm13 = vmor %vm885_vm12, %vm886_vm11  ;;  %v847_v16 = vand.u32 2147483648, %v834_v2  ;;  %v845_v18 = vand.u32 2147483647, %v834_v2  ;;  %vm841_vm1 = vweird.f32 %v834_v2 }
 0x427   : > { %v882_v3 = vsub.f32 1.0, %v881_v1 }
 0x428   : > { %v848_v21 = vor.u32 1.1754944e-38, %v847_v16  ;;  %vm846_vm3 = vcmp.eq.f32.partialorder %v845_v18, 8.507059e+37 }
 0x429   : > { %v883_v5 = vmul.f32 %v1228_v0, %v882_v3 }
 0x42b   : > { %v884_v7 = vadd.f32 %v1228_v0, %v883_v5 }
 0x42c   : > { %v1230_v8 = vpop.eup %1229 }
 0x42d   : > { %v888_v10 = vsel %vm887_vm13, %v1228_v0, %v884_v7  ;;  %v837_v11 = vmul.f32 %v1230_v8, %v834_v2  ;;  %vm842_vm15 = vweird.f32 %v1230_v8 }
 0x42e   : > { %v893_v13 = vsel %vm890_vm14, %v892_v9, %v888_v10  ;;  %vm843_vm2 = vmor %vm841_vm1, %vm842_vm15 }
 0x42f   : > { %v894_v14 = vmul.f32 %v893_v13, %v873_v12  ;;  %v838_v15 = vsub.f32 1.0, %v837_v11 }
 0x431   : > { %v839_v17 = vmul.f32 %v1230_v8, %v838_v15  ;;  %v895_v47 = vpack.c.bf16 %v894_v14, %v894_v14 }
 0x433   : > { %v840_v20 = vadd.f32 %v1230_v8, %v839_v17  ;;  %1107 = vmatmul.msk.bf16.vlgmr.msra.gmra.mxu2 %vm378_vm0, %v895_v47 }
 0x435   : > { %v844_v22 = vsel %vm843_vm2, %v1230_v8, %v840_v20 }
 0x436   : > { %v849_v26 = vsel %vm846_vm3, %v848_v21, %v844_v22 }
 0x437   : > { %v850_v27 = vmul.f32 %v849_v26, %v829_v25 }
 0x439   : > { %v851_v28 = vpack.c.bf16 %v850_v27, %v850_v27 }
 0x43b   : > { %1106 = vmatmul.msk.bf16.vlgmr.msra.gmra.mxu0 %vm378_vm0, %v851_v28  ;;  %vm922_vm0 = vcmask 261120  }
 0x441   : > { %v825_v29 = vpop.f32.mrf.mxu3 }
 0x449   : > { %v827_v30 = vpop.f32.mrf.mxu3 }
 0x481   : > { %v806_v31 = vpop.f32.mrf.mxu1 }
 0x482   : > { %v826_v24 = vadd.f32 %v825_v29, %v806_v31 }
 0x489   : > { %v808_v19 = vpop.f32.mrf.mxu1 }
 0x4b6   : > { %v912_v23 = vpop.f32.mrf.mxu2 }
 0x4b8   : > { %v868_v32 = vpop.f32.mrf.mxu0 }
 0x4b9   : > { %v872_v33 = vadd.f32 %v868_v32, %v826_v24 }
 0x4bb   : > { %v916_v35 = vadd.f32 %v912_v23, %v872_v33 }
 0x4bd   : > { %v921_v36 = vadd.f32 %v1206_v34, %v916_v35 }
 0x4be   : > { %v914_v37 = vpop.f32.mrf.mxu2 }
 0x4bf   : > { %923 = vst.msk [vmem:[%s363_s15] sm:$0xff] %vm922_vm0, %v921_v36 }
 0x4c0   : > { %v870_v38 = vpop.f32.mrf.mxu0 }
 0x4c1   : > { %1378 = shalt.err (!%p1375_p1)
}
 0x4c2   : > { %1122 = dma.vmem_to_hbm [thread:$0]  (%p1532_p8), %s939_s17, 128, %s941_s25, %s925_s21  }
 0x4c3 PF: > { %s1825_s8 = sld [smem:[#allocation19_spill]]  ;;  %s952_s24 = sand.u32 1, %s1421_s18  }
 0x4c4   : > { %p1139_p2 = pnand %p1083_p10, %p1539_p9  ;;  %s953_s9 = scalar_lea.sflag [#allocation7], %s952_s24 }
 0x4c6   : > { %p1140_p4 = pneg %p1139_p2 }
 0x4c8   : > { %1416 = dma.done.wait (%p1140_p4), %s953_s9, 128  }
 0x4c9   : > { %1418 = vsyncadd (%p1140_p4), %s953_s9, 4294967168  ;;  %s25_s23 = sadd.s32 1, %s1825_s8   ;;  %s1826_s10 = sld [smem:[#allocation22_spill]] }
 0x4ca   : > { %p22_p5 = scmp.ge.s32.totalorder %s25_s23, 4   ;;  %s1827_s21 = sld [smem:[#allocation18_spill]] }
 0x4cb   : > { %s1828_s22 = sld [smem:[#allocation20_spill]]  ;;  %s1829_s18 = smov %s1425_s19 }
 0x4cc   : > { %s1830_s19 = smov %s1429_s20  ;;  %24 = sbr.rel (!%p22_p5) target bundleno = 12 (0xc), region = 130 }
 0x4cf   : > { %s1831_s20 = smov %s1826_s10 }
 0x4d1   :  { %959 = vsyncpa [#allocation6], 1 }
 0x4d2   :  { %961 = vsyncpa [#allocation6 + $0x1], 1 }
 0x4d3   :  { %962 = vsyncpa [#allocation9], 1 }
 0x4d4   :  { %964 = vsyncpa [#allocation9 + $0x1], 1 }
 0x4d5   :  { %965 = vsyncpa [#allocation12], 1 }
 0x4d6   :  { %966 = vsyncpa [#allocation7], 1 }
 0x4d7   :  { %968 = vsyncpa [#allocation7 + $0x1], 1 }

</bundles_post_ra>
